<compile_context>
chip_gen: v7x
topology: tpu7x:2x2x1
jax: 0.10.0
libtpu: 0.0.40
codegen_flags: <defaults>
</compile_context>

<pallas_src>
import functools

import jax
import jax.numpy as jnp
from jax.experimental import pallas as pl
from jax.experimental.pallas import tpu as pltpu


# ----------------------------------------------------------------------------
# Pallas kernels
# ----------------------------------------------------------------------------
def _matmul_bn_relu6_kernel(p_ref, w_ref, scale_ref, bias_ref, o_ref):
    """conv (as matmul over im2col patches) + folded BN + ReLU6 for one row tile."""
    acc = jnp.dot(
        p_ref[...].astype(jnp.float32),
        w_ref[...].astype(jnp.float32),
        preferred_element_type=jnp.float32,
    )
    y = acc * scale_ref[...] + bias_ref[...]
    o_ref[...] = jnp.clip(y, 0.0, 6.0).astype(o_ref.dtype)


def _resblock_tail_kernel(p_ref, w2_ref, s2_ref, b2_ref, x_ref,
                          w3_ref, s3_ref, b3_ref, o_ref):
    """conv2 + BN2 + ReLU6 + residual add + 1x1 conv + BN3 + ReLU6, one row tile."""
    h = jnp.dot(
        p_ref[...].astype(jnp.float32),
        w2_ref[...].astype(jnp.float32),
        preferred_element_type=jnp.float32,
    )
    h = jnp.clip(h * s2_ref[...] + b2_ref[...], 0.0, 6.0)
    s = x_ref[...].astype(jnp.float32) + h            # residual add
    y = jnp.dot(s, w3_ref[...].astype(jnp.float32),
                preferred_element_type=jnp.float32)   # 1x1 conv
    y = jnp.clip(y * s3_ref[...] + b3_ref[...], 0.0, 6.0)
    o_ref[...] = y.astype(o_ref.dtype)


# ----------------------------------------------------------------------------
# Wrappers
# ----------------------------------------------------------------------------
def _round_up(x, m):
    return ((x + m - 1) // m) * m


def _fold_bn(conv_bias, gamma, beta, mean, var, eps=1e-5):
    """Fold conv bias + inference BatchNorm into per-channel (scale, bias)."""
    s = (gamma * jax.lax.rsqrt(var + eps)).astype(jnp.float32)
    b = ((conv_bias - mean) * s + beta).astype(jnp.float32)
    return s.reshape(1, -1), b.reshape(1, -1)


def _im2col_3x3(x_nhwc):
    """'same' 3x3 patches: (N,H,W,C) -> (N*H*W, 9*C), flattened (dy, dx, cin)."""
    n, h, w, c = x_nhwc.shape
    xp = jnp.pad(x_nhwc, ((0, 0), (1, 1), (1, 1), (0, 0)))
    cols = [xp[:, dy:dy + h, dx:dx + w, :] for dy in range(3) for dx in range(3)]
    return jnp.concatenate(cols, axis=-1).reshape(n * h * w, 9 * c)


def _fused_conv_bn_relu6(patches, w, scale, bias, out_dtype, *, tile_m=256):
    m, k = patches.shape
    c = w.shape[1]
    tile_m = min(tile_m, _round_up(m, 8))
    m_pad = _round_up(m, tile_m)
    if m_pad != m:
        patches = jnp.pad(patches, ((0, m_pad - m), (0, 0)))
    grid = (m_pad // tile_m,)

    out = pl.pallas_call(
        _matmul_bn_relu6_kernel,
        out_shape=jax.ShapeDtypeStruct((m_pad, c), out_dtype),
        grid_spec=pltpu.PrefetchScalarGridSpec(
            num_scalar_prefetch=0,
            grid=grid,
            in_specs=[
                pl.BlockSpec((tile_m, k), lambda i: (i, 0)),
                pl.BlockSpec((k, c), lambda i: (0, 0)),
                pl.BlockSpec((1, c), lambda i: (0, 0)),
                pl.BlockSpec((1, c), lambda i: (0, 0)),
            ],
            out_specs=pl.BlockSpec((tile_m, c), lambda i: (i, 0)),
        ),
        compiler_params=pltpu.CompilerParams(
            dimension_semantics=("parallel",),
        ),
    )(patches, w, scale, bias)
    return out[:m]


def _fused_resblock_tail(patches, w2, s2, b2, x_res, w3, s3, b3, out_dtype,
                         *, tile_m=256):
    m, k = patches.shape
    c = w2.shape[1]
    cout = w3.shape[1]
    tile_m = min(tile_m, _round_up(m, 8))
    m_pad = _round_up(m, tile_m)
    if m_pad != m:
        patches = jnp.pad(patches, ((0, m_pad - m), (0, 0)))
        x_res = jnp.pad(x_res, ((0, m_pad - m), (0, 0)))
    grid = (m_pad // tile_m,)

    out = pl.pallas_call(
        _resblock_tail_kernel,
        out_shape=jax.ShapeDtypeStruct((m_pad, cout), out_dtype),
        grid_spec=pltpu.PrefetchScalarGridSpec(
            num_scalar_prefetch=0,
            grid=grid,
            in_specs=[
                pl.BlockSpec((tile_m, k), lambda i: (i, 0)),
                pl.BlockSpec((k, c), lambda i: (0, 0)),
                pl.BlockSpec((1, c), lambda i: (0, 0)),
                pl.BlockSpec((1, c), lambda i: (0, 0)),
                pl.BlockSpec((tile_m, c), lambda i: (i, 0)),
                pl.BlockSpec((c, cout), lambda i: (0, 0)),
                pl.BlockSpec((1, cout), lambda i: (0, 0)),
                pl.BlockSpec((1, cout), lambda i: (0, 0)),
            ],
            out_specs=pl.BlockSpec((tile_m, cout), lambda i: (i, 0)),
        ),
        compiler_params=pltpu.CompilerParams(
            dimension_semantics=("parallel",),
        ),
    )(patches, w2, s2, b2, x_res, w3, s3, b3)
    return out[:m]


def simple_decoder_forward(x_nchw, params, *, tile_m=256):
    """Forward pass of SimpleDecoder (upsample_level=2), inference-mode BN."""
    dt = x_nchw.dtype
    x = jnp.transpose(x_nchw, (0, 2, 3, 1))                     # NCHW -> NHWC
    x = jnp.repeat(jnp.repeat(x, 2, axis=1), 2, axis=2)         # nearest 2x upsample
    n, h, w, cin = x.shape
    m = n * h * w

    s1, fb1 = _fold_bn(params["b1"], params["g1"], params["beta1"], params["m1"], params["v1"])
    s2, fb2 = _fold_bn(params["b2"], params["g2"], params["beta2"], params["m2"], params["v2"])
    s3, fb3 = _fold_bn(params["b3"], params["g3"], params["beta3"], params["m3"], params["v3"])

    # --- conv1 + norm1 + relu6 ---
    p1 = _im2col_3x3(x)                                         # (M, 9*Cin)
    w1m = params["w1"].reshape(9 * cin, cin).astype(dt)
    h1 = _fused_conv_bn_relu6(p1, w1m, s1, fb1, dt, tile_m=tile_m)

    # --- conv2 + norm2 + relu6 + residual + 1x1 conv + norm3 + relu6 ---
    p2 = _im2col_3x3(h1.reshape(n, h, w, cin))                  # (M, 9*Cin)
    w2m = params["w2"].reshape(9 * cin, cin).astype(dt)
    w3m = params["w3"].astype(dt)                               # (Cin, Cout) 1x1 conv
    y = _fused_resblock_tail(p2, w2m, s2, fb2, x.reshape(m, cin),
                             w3m, s3, fb3, dt, tile_m=tile_m)

    cout = y.shape[-1]
    return jnp.transpose(y.reshape(n, h, w, cout), (0, 3, 1, 2))  # NHWC -> NCHW


# ----------------------------------------------------------------------------
# Pure-JAX reference (same semantics, XLA conv ops) for the correctness check
# ----------------------------------------------------------------------------
def _reference_forward(x_nchw, p, eps=1e-5):
    x = jnp.transpose(x_nchw, (0, 2, 3, 1))
    x = jnp.repeat(jnp.repeat(x, 2, axis=1), 2, axis=2)

    def conv3(v, w, b):
        return jax.lax.conv_general_dilated(
            v, w, (1, 1), "SAME",
            dimension_numbers=("NHWC", "HWIO", "NHWC")) + b

    def bn(v, g, be, mu, var):
        return (v - mu) * g * jax.lax.rsqrt(var + eps) + be

    relu6 = lambda v: jnp.clip(v, 0.0, 6.0)

    h = relu6(bn(conv3(x, p["w1"], p["b1"]), p["g1"], p["beta1"], p["m1"], p["v1"]))
    h = relu6(bn(conv3(h, p["w2"], p["b2"]), p["g2"], p["beta2"], p["m2"], p["v2"]))
    r = x + h
    y = jnp.einsum("nhwc,cf->nhwf", r, p["w3"]) + p["b3"]
    y = relu6(bn(y, p["g3"], p["beta3"], p["m3"], p["v3"]))
    return jnp.transpose(y, (0, 3, 1, 2))


# ----------------------------------------------------------------------------
# Self-test
# ----------------------------------------------------------------------------
if __name__ == "__main__":
    key = jax.random.PRNGKey(0)
    ks = jax.random.split(key, 24)

    N, CIN, COUT, H0, W0 = 2, 4, 8, 8, 8   # upsampled spatial = 16x16
    x = jax.random.normal(ks[0], (N, CIN, H0, W0), jnp.float32)

    def bn_params(i, c):
        return dict(
            g=1.0 + 0.1 * jax.random.normal(ks[i], (c,), jnp.float32),
            beta=0.1 * jax.random.normal(ks[i + 1], (c,), jnp.float32),
            m=0.1 * jax.random.normal(ks[i + 2], (c,), jnp.float32),
            v=jax.random.uniform(ks[i + 3], (c,), jnp.float32, 0.5, 1.5),
        )

    bn1, bn2, bn3 = bn_params(3, CIN), bn_params(7, CIN), bn_params(11, COUT)
    params = {
        "w1": 0.2 * jax.random.normal(ks[15], (3, 3, CIN, CIN), jnp.float32),
        "b1": 0.1 * jax.random.normal(ks[16], (CIN,), jnp.float32),
        "g1": bn1["g"], "beta1": bn1["beta"], "m1": bn1["m"], "v1": bn1["v"],
        "w2": 0.2 * jax.random.normal(ks[17], (3, 3, CIN, CIN), jnp.float32),
        "b2": 0.1 * jax.random.normal(ks[18], (CIN,), jnp.float32),
        "g2": bn2["g"], "beta2": bn2["beta"], "m2": bn2["m"], "v2": bn2["v"],
        "w3": 0.3 * jax.random.normal(ks[19], (CIN, COUT), jnp.float32),
        "b3": 0.1 * jax.random.normal(ks[20], (COUT,), jnp.float32),
        "g3": bn3["g"], "beta3": bn3["beta"], "m3": bn3["m"], "v3": bn3["v"],
    }

    out = simple_decoder_forward(x, params, tile_m=256)
    out = jax.block_until_ready(out)

    ref = _reference_forward(x, params)
    assert out.shape == (N, COUT, 2 * H0, 2 * W0), f"bad shape {out.shape}"
    assert jnp.allclose(out, ref, atol=1e-4, rtol=1e-4), "mismatch vs reference"

    print("KERNEL_OK")
</pallas_src>

<mosaic_0001>
module attributes {stable_mosaic.version = 11 : i64} {
  func.func @_matmul_bn_relu6_kernel(%arg0: i32, %arg1: memref<256x36xf32, #tpu.memory_space<vmem>>, %arg2: memref<36x4xf32, #tpu.memory_space<vmem>>, %arg3: memref<1x4xf32, #tpu.memory_space<vmem>>, %arg4: memref<1x4xf32, #tpu.memory_space<vmem>>, %arg5: memref<256x4xf32, #tpu.memory_space<vmem>>) attributes {dimension_semantics = [#tpu.dimension_semantics<parallel>], iteration_bounds = array<i64: 2>, scalar_prefetch = 0 : i64, scratch_operands = 0 : i64, tpu.core_type = #tpu.core_type<tc>, window_params = [{transform_indices = @transform_0, window_bounds = array<i64: 256, 36>}, {pipeline_mode = #tpu.pipeline_mode<synchronous>, transform_indices = @transform_1, window_bounds = array<i64: 36, 4>}, {pipeline_mode = #tpu.pipeline_mode<synchronous>, transform_indices = @transform_2, window_bounds = array<i64: 1, 4>}, {pipeline_mode = #tpu.pipeline_mode<synchronous>, transform_indices = @transform_3, window_bounds = array<i64: 1, 4>}, {transform_indices = @transform_4, window_bounds = array<i64: 256, 4>}]} {
    %c0 = arith.constant 0 : index
    %c0_0 = arith.constant 0 : index
    %0 = vector.load %arg1[%c0, %c0_0] : memref<256x36xf32, #tpu.memory_space<vmem>>, vector<256x36xf32>
    %c0_1 = arith.constant 0 : index
    %c0_2 = arith.constant 0 : index
    %1 = vector.load %arg2[%c0_1, %c0_2] : memref<36x4xf32, #tpu.memory_space<vmem>>, vector<36x4xf32>
    %cst = arith.constant dense<0.000000e+00> : vector<256x4xf32>
    %2 = tpu.matmul %0, %1, %cst {dimension_numbers = #tpu.dot_dimension_numbers<[1], [0], [0], [1], [0, 0, 1, 1], [], []>} : vector<256x36xf32>, vector<36x4xf32>, vector<256x4xf32> -> vector<256x4xf32>
    %c0_3 = arith.constant 0 : index
    %c0_4 = arith.constant 0 : index
    %3 = vector.load %arg3[%c0_3, %c0_4] : memref<1x4xf32, #tpu.memory_space<vmem>>, vector<1x4xf32>
    %4 = vector.broadcast %3 : vector<1x4xf32> to vector<256x4xf32>
    %5 = arith.mulf %2, %4 : vector<256x4xf32>
    %c0_5 = arith.constant 0 : index
    %c0_6 = arith.constant 0 : index
    %6 = vector.load %arg4[%c0_5, %c0_6] : memref<1x4xf32, #tpu.memory_space<vmem>>, vector<1x4xf32>
    %7 = vector.broadcast %6 : vector<1x4xf32> to vector<256x4xf32>
    %8 = arith.addf %5, %7 : vector<256x4xf32>
    %cst_7 = arith.constant 0.000000e+00 : f32
    %cst_8 = arith.constant 6.000000e+00 : f32
    %9 = vector.broadcast %cst_7 : f32 to vector<256x4xf32>
    %10 = arith.maximumf %9, %8 : vector<256x4xf32>
    %11 = vector.broadcast %cst_8 : f32 to vector<256x4xf32>
    %12 = arith.minimumf %11, %10 : vector<256x4xf32>
    %c0_9 = arith.constant 0 : index
    %c0_10 = arith.constant 0 : index
    %13 = vector.load %arg5[%c0_9, %c0_10] : memref<256x4xf32, #tpu.memory_space<vmem>>, vector<256x4xf32>
    tpu.vector_store %arg5[%c0_9, %c0_10], %12 {strides = array<i32>} : memref<256x4xf32, #tpu.memory_space<vmem>>, vector<256x4xf32>,
    return
  }
  func.func @transform_0(%arg0: i32) -> (i32, i32) {
    %c0_i32 = arith.constant 0 : i32
    %c0_i32_0 = arith.constant 0 : i32
    return %arg0, %c0_i32 : i32, i32
  }
  func.func @transform_1(%arg0: i32) -> (i32, i32) {
    %c0_i32 = arith.constant 0 : i32
    %c0_i32_0 = arith.constant 0 : i32
    %c0_i32_1 = arith.constant 0 : i32
    return %c0_i32, %c0_i32_0 : i32, i32
  }
  func.func @transform_2(%arg0: i32) -> (i32, i32) {
    %c0_i32 = arith.constant 0 : i32
    %c0_i32_0 = arith.constant 0 : i32
    %c0_i32_1 = arith.constant 0 : i32
    return %c0_i32, %c0_i32_0 : i32, i32
  }
  func.func @transform_3(%arg0: i32) -> (i32, i32) {
    %c0_i32 = arith.constant 0 : i32
    %c0_i32_0 = arith.constant 0 : i32
    %c0_i32_1 = arith.constant 0 : i32
    return %c0_i32, %c0_i32_0 : i32, i32
  }
  func.func @transform_4(%arg0: i32) -> (i32, i32) {
    %c0_i32 = arith.constant 0 : i32
    %c0_i32_0 = arith.constant 0 : i32
    return %arg0, %c0_i32 : i32, i32
  }
}

</mosaic_0001>

<bundles_post_ra>
// kernel: tpu_custom_call.1
= control target key start
LH: loop header
LB: loop body
LE: loop exit
PB: predicated region body
PF: predicated region fallthrough
CT: control target
= control target key end

     0   :  { %s991_s15 = smov 0   ;;  %s1240_s0 = inlined_call_operand.vmem [shape: f32[512,36], index: 0, kind: input, shape index: {}]   ;;  %s1241_s1 = inlined_call_operand.vmem [shape: f32[36,4], index: 1, kind: input, shape index: {}]   ;;  %s1242_s2 = inlined_call_operand.vmem [shape: f32[1,4], index: 2, kind: input, shape index: {}]   ;;  %s1243_s3 = inlined_call_operand.vmem [shape: f32[1,4], index: 3, kind: input, shape index: {}]   ;;  %s1244_s4 = inlined_call_operand.vmem [shape: f32[512,4], index: 4, kind: output, shape index: {}]  }
   0x1 LB: > { %s795_s16 = sadd.s32 4294967295, %s964_s15   ;;  %p799_p0 = scmp.ge.s32.totalorder %s964_s15, 1  ;;  %s964_s15 = sphi %s991_s15, %s14_s15  }
   0x2   : > { %p163_p1 = scmp.lt.s32.totalorder %s964_s15, 3 }
   0x4   : > { %p164_p2 = pnand %p799_p0, %p163_p1 }
   0x5   : > { %v233_v0 = vld [vmem:[%s1241_s1] sm:$0xff] (!%p164_p2)  ;;  %v234_v1 = vld [vmem:[%s1241_s1 + $0x8] sm:$0xff] (!%p164_p2)  ;;  %v235_v2 = vld [vmem:[%s1241_s1 + $0x10] sm:$0xff] (!%p164_p2)  ;;  %s800_s23 = sshll.u32 (!%p164_p2), %s795_s16, 5  ;;  %vm335_vm0 = vcmask (!%p164_p2), 1043456   ;;  %vm238_vm1 = vcmask (!%p164_p2), 293888  }
   0x6   : > { %167 = sbr.rel (%p164_p2) target bundleno = 269 (0x10d), region = 36  ;;  %v936_v3 = vpack.c.bf16 (!%p164_p2), %v234_v1, %v233_v0  ;;  %v236_v4 = vld [vmem:[%s1241_s1 + $0x18] sm:$0xff] (!%p164_p2)  ;;  %p190_p3 = scmp.lt.s32.totalorder (!%p164_p2), %s800_s23, 63  ;;  %v237_v6 = vld [vmem:[%s1241_s1 + $0x20] sm:$0xf] (!%p164_p2)  ;;  %vm706_vm2 = vcmask (!%p164_p2), 31744  }
   0x7   : > { %v940_v5 = vpack.c.bf16 (!%p164_p2), %v236_v4, %v235_v2  ;;  %v1095_v39 = vld [vmem:[%s1242_s2] ss:$0 sm:$0xff] (!%p164_p2) }
   0x8   : > { %937 = vmatprep.subr.bf16.mxu0 (!%p164_p2), %v936_v3  ;;  %944 = vmatprep.subr.bf16.mxu1 (!%p164_p2), %v936_v3  ;;  %v1100_v41 = vld [vmem:[%s1243_s3] ss:$0 sm:$0xff] (!%p164_p2) }
   0x9   : > { %939 = vmatpush3.bf16.msra.mxu0 (!%p164_p2), %v936_v3  ;;  %947 = vmatpush3.bf16.msra.mxu1 (!%p164_p2), %v936_v3 }
   0xa   : > { %941 = vmatprep.subr.bf16.mxu0 (!%p164_p2), %v940_v5  ;;  %945 = vmatprep.subr.bf16.mxu1 (!%p164_p2), %v940_v5 }
   0xd   : > { %s1246_s23 = smov (!%p190_p3, %s800_s23), 63  ;;  %943 = vmatpush3.bf16.msra.mxu0 %v940_v5  ;;  %948 = vmatpush3.bf16.msra.mxu1 %v940_v5 }
   0xe   : > { %s801_s26 = sshll.u32 %s1246_s23, 3  ;;  %886 = vmatprep.subr.msk.mxu0 %vm335_vm0, %v237_v6  ;;  %946 = vmatprep.subr.msk.mxu1 %vm335_vm0, %v237_v6 }
   0xf   : > { %s1022_s5 = scalar_lea.vmem %s1240_s0, %s801_s26  ;;  %s1117_s12 = scalar_lea.vmem %s1244_s4, %s801_s26 }
  0x10   : > { %v201_v7 = vld [vmem:[%s1022_s5] sm:$0xff]  ;;  %v202_v9 = vld [vmem:[%s1022_s5 + $0x8] sm:$0xff]  ;;  %v203_v11 = vld [vmem:[%s1022_s5 + $0x10] sm:$0xff] }
  0x11   : > { %v217_v8 = vld [vmem:[%s1022_s5 + $0x80] sm:$0xff]  ;;  %888 = vmatprep.mubr.msk.f32.mxu0 %vm238_vm1, %v201_v7  ;;  %v218_v10 = vld [vmem:[%s1022_s5 + $0x88] sm:$0xff]  ;;  %v219_v12 = vld [vmem:[%s1022_s5 + $0x90] sm:$0xff]  ;;  %887 = vmatpush3.msk.msra.mxu0 %vm335_vm0, %v237_v6 }
  0x12   : > { %912 = vmatprep.mubr.msk.f32.mxu1 %vm238_vm1, %v217_v8  ;;  %949 = vmatpush3.msk.msra.mxu1 %vm335_vm0, %v237_v6  ;;  %v204_v13 = vld [vmem:[%s1022_s5 + $0x18] sm:$0xff]  ;;  %v205_v15 = vld [vmem:[%s1022_s5 + $0x20] sm:$0xff]  ;;  %v206_v17 = vld [vmem:[%s1022_s5 + $0x28] sm:$0xff] }
  0x13   : > { %889 = vmatmul.mubr.msk.f32.vlgmr.msra.gmra.mrb[0].mxu0 %vm238_vm1, %v202_v9  ;;  %913 = vmatmul.mubr.msk.f32.vlgmr.msra.gmra.mrb[0].mxu1 %vm238_vm1, %v218_v10  ;;  %v220_v14 = vld [vmem:[%s1022_s5 + $0x98] sm:$0xff]  ;;  %v221_v16 = vld [vmem:[%s1022_s5 + $0xa0] sm:$0xff]  ;;  %v222_v18 = vld [vmem:[%s1022_s5 + $0xa8] sm:$0xff] }
  0x14   : > { %891 = vmatprep.mubr.msk.f32.mxu0 %vm238_vm1, %v203_v11  ;;  %915 = vmatprep.mubr.msk.f32.mxu1 %vm238_vm1, %v219_v12  ;;  %v207_v19 = vld [vmem:[%s1022_s5 + $0x30] sm:$0xff]  ;;  %v208_v21 = vld [vmem:[%s1022_s5 + $0x38] sm:$0xff]  ;;  %v209_v23 = vld [vmem:[%s1022_s5 + $0x40] sm:$0xff] }
  0x15   : > { %v223_v20 = vld [vmem:[%s1022_s5 + $0xb0] sm:$0xff]  ;;  %v224_v22 = vld [vmem:[%s1022_s5 + $0xb8] sm:$0xff]  ;;  %v225_v24 = vld [vmem:[%s1022_s5 + $0xc0] sm:$0xff] }
  0x16   : > { %v210_v25 = vld [vmem:[%s1022_s5 + $0x48] sm:$0xff]  ;;  %v211_v27 = vld [vmem:[%s1022_s5 + $0x50] sm:$0xff]  ;;  %v212_v29 = vld [vmem:[%s1022_s5 + $0x58] sm:$0xff] }
  0x17   : > { %892 = vmatmul.mubr.msk.f32.gmra.mrb[2].mxu0 %vm238_vm1, %v204_v13  ;;  %916 = vmatmul.mubr.msk.f32.gmra.mrb[2].mxu1 %vm238_vm1, %v220_v14  ;;  %v226_v26 = vld [vmem:[%s1022_s5 + $0xc8] sm:$0xff]  ;;  %v227_v28 = vld [vmem:[%s1022_s5 + $0xd0] sm:$0xff]  ;;  %v228_v30 = vld [vmem:[%s1022_s5 + $0xd8] sm:$0xff] }
  0x18   : > { %894 = vmatprep.mubr.msk.f32.mxu0 %vm238_vm1, %v205_v15  ;;  %918 = vmatprep.mubr.msk.f32.mxu1 %vm238_vm1, %v221_v16  ;;  %v213_v31 = vld [vmem:[%s1022_s5 + $0x60] sm:$0xff]  ;;  %v214_v33 = vld [vmem:[%s1022_s5 + $0x68] sm:$0xff]  ;;  %v215_v35 = vld [vmem:[%s1022_s5 + $0x70] sm:$0xff] }
  0x19   : > { %v229_v32 = vld [vmem:[%s1022_s5 + $0xe0] sm:$0xff]  ;;  %v230_v34 = vld [vmem:[%s1022_s5 + $0xe8] sm:$0xff]  ;;  %v231_v36 = vld [vmem:[%s1022_s5 + $0xf0] sm:$0xff] }
  0x1a   : > { %v216_v37 = vld [vmem:[%s1022_s5 + $0x78] sm:$0xff] }
  0x1b   : > { %895 = vmatmul.mubr.msk.f32.gmra.mrb[4].mxu0 %vm238_vm1, %v206_v17  ;;  %919 = vmatmul.mubr.msk.f32.gmra.mrb[4].mxu1 %vm238_vm1, %v222_v18  ;;  %v232_v38 = vld [vmem:[%s1022_s5 + $0xf8] sm:$0xff] }
  0x1c   : > { %897 = vmatprep.mubr.msk.f32.mxu0 %vm238_vm1, %v207_v19  ;;  %921 = vmatprep.mubr.msk.f32.mxu1 %vm238_vm1, %v223_v20 }
  0x1f   : > { %898 = vmatmul.mubr.msk.f32.gmra.mrb[6].mxu0 %vm238_vm1, %v208_v21  ;;  %922 = vmatmul.mubr.msk.f32.gmra.mrb[6].mxu1 %vm238_vm1, %v224_v22 }
  0x20   : > { %900 = vmatprep.mubr.msk.f32.mxu0 %vm238_vm1, %v209_v23  ;;  %924 = vmatprep.mubr.msk.f32.mxu1 %vm238_vm1, %v225_v24 }
  0x23   : > { %901 = vmatmul.mubr.msk.f32.gmra.mrb[8].mxu0 %vm238_vm1, %v210_v25  ;;  %925 = vmatmul.mubr.msk.f32.gmra.mrb[8].mxu1 %vm238_vm1, %v226_v26 }
  0x24   : > { %903 = vmatprep.mubr.msk.f32.mxu0 %vm238_vm1, %v211_v27  ;;  %927 = vmatprep.mubr.msk.f32.mxu1 %vm238_vm1, %v227_v28 }
  0x27   : > { %904 = vmatmul.mubr.msk.f32.gmra.mrb[10].mxu0 %vm238_vm1, %v212_v29  ;;  %928 = vmatmul.mubr.msk.f32.gmra.mrb[10].mxu1 %vm238_vm1, %v228_v30 }
  0x28   : > { %906 = vmatprep.mubr.msk.f32.mxu0 %vm238_vm1, %v213_v31  ;;  %930 = vmatprep.mubr.msk.f32.mxu1 %vm238_vm1, %v229_v32 }
  0x2b   : > { %907 = vmatmul.mubr.msk.f32.gmra.mrb[12].mxu0 %vm238_vm1, %v214_v33  ;;  %931 = vmatmul.mubr.msk.f32.gmra.mrb[12].mxu1 %vm238_vm1, %v230_v34 }
  0x2c   : > { %909 = vmatprep.mubr.msk.f32.mxu0 %vm238_vm1, %v215_v35  ;;  %933 = vmatprep.mubr.msk.f32.mxu1 %vm238_vm1, %v231_v36 }
  0x2f   : > { %910 = vmatmul.mubr.msk.f32.gmra.mrb[14].mxu0 %vm238_vm1, %v216_v37  ;;  %934 = vmatmul.mubr.msk.f32.gmra.mrb[14].mxu1 %vm238_vm1, %v232_v38 }
  0xe6   : > { %v890_v40 = vpop.f32.mrb[0].mxu0  ;;  %v914_v42 = vpop.f32.mrb[0].mxu1 }
  0xe7   : > { %v572_v43 = vmul.f32 %v890_v40, %v1095_v39  ;;  %v588_v44 = vmul.f32 %v914_v42, %v1095_v39  ;;  %v405_v45 = vpop.f32.mrb[1].mxu0  ;;  %v485_v46 = vpop.f32.mrb[1].mxu1 }
  0xe8   : > { %v571_v47 = vmul.f32 %v1095_v39, %v405_v45  ;;  %v587_v48 = vmul.f32 %v1095_v39, %v485_v46 }
  0xe9   : > { %v611_v49 = vadd.f32 %v1100_v41, %v572_v43  ;;  %v627_v50 = vadd.f32 %v1100_v41, %v588_v44 }
  0xea   : > { %v610_v51 = vadd.f32 %v1100_v41, %v571_v47  ;;  %v626_v52 = vadd.f32 %v1100_v41, %v587_v48  ;;  %v893_v53 = vpop.f32.mrb[2].mxu0  ;;  %v917_v54 = vpop.f32.mrb[2].mxu1 }
  0xeb   : > { %v643_v55 = vmax.f32 %v611_v49, 0.0  ;;  %v659_v56 = vmax.f32 %v627_v50, 0.0  ;;  %v574_v57 = vmul.f32 %v893_v53, %v1095_v39  ;;  %v590_v58 = vmul.f32 %v917_v54, %v1095_v39  ;;  %v415_v59 = vpop.f32.mrb[3].mxu0  ;;  %v495_v60 = vpop.f32.mrb[3].mxu1 }
  0xec   : > { %v642_v61 = vmax.f32 %v610_v51, 0.0  ;;  %v658_v62 = vmax.f32 %v626_v52, 0.0  ;;  %v573_v63 = vmul.f32 %v1095_v39, %v415_v59  ;;  %v589_v0 = vmul.f32 %v1095_v39, %v495_v60 }
  0xed   : > { %v675_v1 = vmin.f32 %v643_v55, 6.0  ;;  %v691_v2 = vmin.f32 %v659_v56, 6.0  ;;  %v613_v3 = vadd.f32 %v1100_v41, %v574_v57  ;;  %v629_v4 = vadd.f32 %v1100_v41, %v590_v58 }
  0xee   : > { %v674_v5 = vmin.f32 %v642_v61, 6.0  ;;  %v690_v6 = vmin.f32 %v658_v62, 6.0  ;;  %v612_v7 = vadd.f32 %v1100_v41, %v573_v63  ;;  %v628_v8 = vadd.f32 %v1100_v41, %v589_v0  ;;  %v896_v9 = vpop.f32.mrb[4].mxu0  ;;  %v920_v10 = vpop.f32.mrb[4].mxu1 }
  0xef   : > { %708 = vst.msk [vmem:[%s1117_s12 + $0x8] sm:$0xff] %vm706_vm2, %v675_v1  ;;  %724 = vst.msk [vmem:[%s1117_s12 + $0x88] sm:$0xff] %vm706_vm2, %v691_v2  ;;  %v645_v11 = vmax.f32 %v613_v3, 0.0  ;;  %v661_v12 = vmax.f32 %v629_v4, 0.0  ;;  %v576_v13 = vmul.f32 %v896_v9, %v1095_v39  ;;  %v592_v14 = vmul.f32 %v920_v10, %v1095_v39  ;;  %v425_v15 = vpop.f32.mrb[5].mxu0  ;;  %v505_v16 = vpop.f32.mrb[5].mxu1 }
  0xf0   : > { %707 = vst.msk [vmem:[%s1117_s12] sm:$0xff] %vm706_vm2, %v674_v5  ;;  %723 = vst.msk [vmem:[%s1117_s12 + $0x80] sm:$0xff] %vm706_vm2, %v690_v6  ;;  %v644_v17 = vmax.f32 %v612_v7, 0.0  ;;  %v660_v18 = vmax.f32 %v628_v8, 0.0  ;;  %v575_v19 = vmul.f32 %v1095_v39, %v425_v15  ;;  %v591_v20 = vmul.f32 %v1095_v39, %v505_v16 }
  0xf1   : > { %v677_v21 = vmin.f32 %v645_v11, 6.0  ;;  %v693_v22 = vmin.f32 %v661_v12, 6.0  ;;  %v615_v23 = vadd.f32 %v1100_v41, %v576_v13  ;;  %v631_v24 = vadd.f32 %v1100_v41, %v592_v14 }
  0xf2   : > { %v676_v25 = vmin.f32 %v644_v17, 6.0  ;;  %v692_v26 = vmin.f32 %v660_v18, 6.0  ;;  %v614_v27 = vadd.f32 %v1100_v41, %v575_v19  ;;  %v630_v28 = vadd.f32 %v1100_v41, %v591_v20  ;;  %v899_v29 = vpop.f32.mrb[6].mxu0  ;;  %v923_v30 = vpop.f32.mrb[6].mxu1 }
  0xf3   : > { %710 = vst.msk [vmem:[%s1117_s12 + $0x18] sm:$0xff] %vm706_vm2, %v677_v21  ;;  %726 = vst.msk [vmem:[%s1117_s12 + $0x98] sm:$0xff] %vm706_vm2, %v693_v22  ;;  %v647_v31 = vmax.f32 %v615_v23, 0.0  ;;  %v663_v32 = vmax.f32 %v631_v24, 0.0  ;;  %v578_v33 = vmul.f32 %v899_v29, %v1095_v39  ;;  %v594_v34 = vmul.f32 %v923_v30, %v1095_v39  ;;  %v435_v35 = vpop.f32.mrb[7].mxu0  ;;  %v515_v36 = vpop.f32.mrb[7].mxu1 }
  0xf4   : > { %709 = vst.msk [vmem:[%s1117_s12 + $0x10] sm:$0xff] %vm706_vm2, %v676_v25  ;;  %725 = vst.msk [vmem:[%s1117_s12 + $0x90] sm:$0xff] %vm706_vm2, %v692_v26  ;;  %v646_v37 = vmax.f32 %v614_v27, 0.0  ;;  %v662_v38 = vmax.f32 %v630_v28, 0.0  ;;  %v577_v40 = vmul.f32 %v1095_v39, %v435_v35  ;;  %v593_v42 = vmul.f32 %v1095_v39, %v515_v36 }
  0xf5   : > { %v679_v43 = vmin.f32 %v647_v31, 6.0  ;;  %v695_v44 = vmin.f32 %v663_v32, 6.0  ;;  %v617_v45 = vadd.f32 %v1100_v41, %v578_v33  ;;  %v633_v46 = vadd.f32 %v1100_v41, %v594_v34 }
  0xf6   : > { %v678_v47 = vmin.f32 %v646_v37, 6.0  ;;  %v694_v48 = vmin.f32 %v662_v38, 6.0  ;;  %v616_v49 = vadd.f32 %v1100_v41, %v577_v40  ;;  %v632_v50 = vadd.f32 %v1100_v41, %v593_v42  ;;  %v902_v51 = vpop.f32.mrb[8].mxu0  ;;  %v926_v52 = vpop.f32.mrb[8].mxu1 }
  0xf7   : > { %712 = vst.msk [vmem:[%s1117_s12 + $0x28] sm:$0xff] %vm706_vm2, %v679_v43  ;;  %728 = vst.msk [vmem:[%s1117_s12 + $0xa8] sm:$0xff] %vm706_vm2, %v695_v44  ;;  %v649_v53 = vmax.f32 %v617_v45, 0.0  ;;  %v665_v54 = vmax.f32 %v633_v46, 0.0  ;;  %v580_v55 = vmul.f32 %v902_v51, %v1095_v39  ;;  %v596_v56 = vmul.f32 %v926_v52, %v1095_v39  ;;  %v445_v57 = vpop.f32.mrb[9].mxu0  ;;  %v525_v58 = vpop.f32.mrb[9].mxu1 }
  0xf8   : > { %711 = vst.msk [vmem:[%s1117_s12 + $0x20] sm:$0xff] %vm706_vm2, %v678_v47  ;;  %727 = vst.msk [vmem:[%s1117_s12 + $0xa0] sm:$0xff] %vm706_vm2, %v694_v48  ;;  %v648_v59 = vmax.f32 %v616_v49, 0.0  ;;  %v664_v60 = vmax.f32 %v632_v50, 0.0  ;;  %v579_v61 = vmul.f32 %v1095_v39, %v445_v57  ;;  %v595_v62 = vmul.f32 %v1095_v39, %v525_v58 }
  0xf9   : > { %v681_v63 = vmin.f32 %v649_v53, 6.0  ;;  %v697_v0 = vmin.f32 %v665_v54, 6.0  ;;  %v619_v1 = vadd.f32 %v1100_v41, %v580_v55  ;;  %v635_v2 = vadd.f32 %v1100_v41, %v596_v56 }
  0xfa   : > { %v680_v3 = vmin.f32 %v648_v59, 6.0  ;;  %v696_v4 = vmin.f32 %v664_v60, 6.0  ;;  %v618_v5 = vadd.f32 %v1100_v41, %v579_v61  ;;  %v634_v6 = vadd.f32 %v1100_v41, %v595_v62  ;;  %v905_v7 = vpop.f32.mrb[10].mxu0  ;;  %v929_v8 = vpop.f32.mrb[10].mxu1 }
  0xfb   : > { %714 = vst.msk [vmem:[%s1117_s12 + $0x38] sm:$0xff] %vm706_vm2, %v681_v63  ;;  %730 = vst.msk [vmem:[%s1117_s12 + $0xb8] sm:$0xff] %vm706_vm2, %v697_v0  ;;  %v651_v9 = vmax.f32 %v619_v1, 0.0  ;;  %v667_v10 = vmax.f32 %v635_v2, 0.0  ;;  %v582_v11 = vmul.f32 %v905_v7, %v1095_v39  ;;  %v598_v12 = vmul.f32 %v929_v8, %v1095_v39  ;;  %v455_v13 = vpop.f32.mrb[11].mxu0  ;;  %v535_v14 = vpop.f32.mrb[11].mxu1 }
  0xfc   : > { %713 = vst.msk [vmem:[%s1117_s12 + $0x30] sm:$0xff] %vm706_vm2, %v680_v3  ;;  %729 = vst.msk [vmem:[%s1117_s12 + $0xb0] sm:$0xff] %vm706_vm2, %v696_v4  ;;  %v650_v15 = vmax.f32 %v618_v5, 0.0  ;;  %v666_v16 = vmax.f32 %v634_v6, 0.0  ;;  %v581_v17 = vmul.f32 %v1095_v39, %v455_v13  ;;  %v597_v18 = vmul.f32 %v1095_v39, %v535_v14 }
  0xfd   : > { %v683_v19 = vmin.f32 %v651_v9, 6.0  ;;  %v699_v20 = vmin.f32 %v667_v10, 6.0  ;;  %v621_v21 = vadd.f32 %v1100_v41, %v582_v11  ;;  %v637_v22 = vadd.f32 %v1100_v41, %v598_v12 }
  0xfe   : > { %v682_v23 = vmin.f32 %v650_v15, 6.0  ;;  %v698_v24 = vmin.f32 %v666_v16, 6.0  ;;  %v620_v25 = vadd.f32 %v1100_v41, %v581_v17  ;;  %v636_v26 = vadd.f32 %v1100_v41, %v597_v18  ;;  %v908_v27 = vpop.f32.mrb[12].mxu0  ;;  %v932_v28 = vpop.f32.mrb[12].mxu1 }
  0xff   : > { %716 = vst.msk [vmem:[%s1117_s12 + $0x48] sm:$0xff] %vm706_vm2, %v683_v19  ;;  %732 = vst.msk [vmem:[%s1117_s12 + $0xc8] sm:$0xff] %vm706_vm2, %v699_v20  ;;  %v653_v29 = vmax.f32 %v621_v21, 0.0  ;;  %v669_v30 = vmax.f32 %v637_v22, 0.0  ;;  %v584_v31 = vmul.f32 %v908_v27, %v1095_v39  ;;  %v600_v32 = vmul.f32 %v932_v28, %v1095_v39  ;;  %v465_v33 = vpop.f32.mrb[13].mxu0  ;;  %v545_v34 = vpop.f32.mrb[13].mxu1 }
 0x100   : > { %715 = vst.msk [vmem:[%s1117_s12 + $0x40] sm:$0xff] %vm706_vm2, %v682_v23  ;;  %731 = vst.msk [vmem:[%s1117_s12 + $0xc0] sm:$0xff] %vm706_vm2, %v698_v24  ;;  %v652_v35 = vmax.f32 %v620_v25, 0.0  ;;  %v668_v36 = vmax.f32 %v636_v26, 0.0  ;;  %v583_v37 = vmul.f32 %v1095_v39, %v465_v33  ;;  %v599_v38 = vmul.f32 %v1095_v39, %v545_v34 }
 0x101   : > { %v685_v40 = vmin.f32 %v653_v29, 6.0  ;;  %v701_v42 = vmin.f32 %v669_v30, 6.0  ;;  %v623_v43 = vadd.f32 %v1100_v41, %v584_v31  ;;  %v639_v44 = vadd.f32 %v1100_v41, %v600_v32 }
 0x102   : > { %v684_v45 = vmin.f32 %v652_v35, 6.0  ;;  %v700_v46 = vmin.f32 %v668_v36, 6.0  ;;  %v622_v47 = vadd.f32 %v1100_v41, %v583_v37  ;;  %v638_v48 = vadd.f32 %v1100_v41, %v599_v38  ;;  %v911_v49 = vpop.f32.mrb[14].mxu0  ;;  %v935_v50 = vpop.f32.mrb[14].mxu1 }
 0x103   : > { %718 = vst.msk [vmem:[%s1117_s12 + $0x58] sm:$0xff] %vm706_vm2, %v685_v40  ;;  %734 = vst.msk [vmem:[%s1117_s12 + $0xd8] sm:$0xff] %vm706_vm2, %v701_v42  ;;  %v655_v51 = vmax.f32 %v623_v43, 0.0  ;;  %v671_v52 = vmax.f32 %v639_v44, 0.0  ;;  %v586_v53 = vmul.f32 %v911_v49, %v1095_v39  ;;  %v602_v54 = vmul.f32 %v935_v50, %v1095_v39  ;;  %v475_v55 = vpop.f32.mrb[15].mxu0  ;;  %v555_v56 = vpop.f32.mrb[15].mxu1 }
 0x104   : > { %717 = vst.msk [vmem:[%s1117_s12 + $0x50] sm:$0xff] %vm706_vm2, %v684_v45  ;;  %733 = vst.msk [vmem:[%s1117_s12 + $0xd0] sm:$0xff] %vm706_vm2, %v700_v46  ;;  %v654_v57 = vmax.f32 %v622_v47, 0.0  ;;  %v670_v58 = vmax.f32 %v638_v48, 0.0  ;;  %v585_v59 = vmul.f32 %v1095_v39, %v475_v55  ;;  %v601_v60 = vmul.f32 %v1095_v39, %v555_v56 }
 0x105   : > { %v687_v61 = vmin.f32 %v655_v51, 6.0  ;;  %v703_v62 = vmin.f32 %v671_v52, 6.0  ;;  %v625_v63 = vadd.f32 %v1100_v41, %v586_v53  ;;  %v641_v0 = vadd.f32 %v1100_v41, %v602_v54 }
 0x106   : > { %v686_v1 = vmin.f32 %v654_v57, 6.0  ;;  %v702_v2 = vmin.f32 %v670_v58, 6.0  ;;  %v624_v3 = vadd.f32 %v1100_v41, %v585_v59  ;;  %v640_v4 = vadd.f32 %v1100_v41, %v601_v60 }
 0x107   : > { %720 = vst.msk [vmem:[%s1117_s12 + $0x68] sm:$0xff] %vm706_vm2, %v687_v61  ;;  %736 = vst.msk [vmem:[%s1117_s12 + $0xe8] sm:$0xff] %vm706_vm2, %v703_v62  ;;  %v657_v39 = vmax.f32 %v625_v63, 0.0  ;;  %v673_v5 = vmax.f32 %v641_v0, 0.0 }
 0x108   : > { %719 = vst.msk [vmem:[%s1117_s12 + $0x60] sm:$0xff] %vm706_vm2, %v686_v1  ;;  %735 = vst.msk [vmem:[%s1117_s12 + $0xe0] sm:$0xff] %vm706_vm2, %v702_v2  ;;  %v656_v6 = vmax.f32 %v624_v3, 0.0  ;;  %v672_v7 = vmax.f32 %v640_v4, 0.0 }
 0x109   : > { %v689_v8 = vmin.f32 %v657_v39, 6.0  ;;  %v705_v9 = vmin.f32 %v673_v5, 6.0 }
 0x10a   : > { %v688_v10 = vmin.f32 %v656_v6, 6.0  ;;  %v704_v11 = vmin.f32 %v672_v7, 6.0 }
 0x10b   : > { %722 = vst.msk [vmem:[%s1117_s12 + $0x78] sm:$0xff] %vm706_vm2, %v689_v8  ;;  %738 = vst.msk [vmem:[%s1117_s12 + $0xf8] sm:$0xff] %vm706_vm2, %v705_v9 }
 0x10c   : > { %721 = vst.msk [vmem:[%s1117_s12 + $0x70] sm:$0xff] %vm706_vm2, %v688_v10  ;;  %737 = vst.msk [vmem:[%s1117_s12 + $0xf0] sm:$0xff] %vm706_vm2, %v704_v11 }
 0x10d PF: > { %s14_s15 = sadd.s32 1, %s964_s15  }
 0x10e   : > { %p11_p4 = scmp.ge.s32.totalorder %s14_s15, 4  }
 0x110   :  { %13 = sbr.rel (!%p11_p4) target bundleno = 1 (0x1), region = 66 }

</bundles_post_ra>
